<compile_context>
chip_gen: v5e
topology: v5e:2x2
jax: 0.10.0
libtpu: 0.0.40
codegen_flags: <defaults>
</compile_context>

<pallas_src>
import functools

import jax
import jax.numpy as jnp
from jax.experimental import pallas as pl
from jax.experimental.pallas import tpu as pltpu


def _ln_withbias_kernel(x_ref, w_ref, b_ref, o_ref):
    x = x_ref[...].astype(jnp.float32)                     # (1, C, T)
    mu = jnp.mean(x, axis=1, keepdims=True)                # (1, 1, T)
    msq = jnp.mean(x * x, axis=1, keepdims=True)           # (1, 1, T)
    var = jnp.maximum(msq - mu * mu, 0.0)                  # unbiased=False
    inv = jax.lax.rsqrt(var + 1e-5)
    w = w_ref[...].astype(jnp.float32)                     # (C, 1) -> bcast lanes
    b = b_ref[...].astype(jnp.float32)
    o_ref[...] = (((x - mu) * inv) * w + b).astype(o_ref.dtype)


def _ln_biasfree_kernel(x_ref, w_ref, o_ref):
    x = x_ref[...].astype(jnp.float32)                     # (1, C, T)
    mu = jnp.mean(x, axis=1, keepdims=True)
    msq = jnp.mean(x * x, axis=1, keepdims=True)
    var = jnp.maximum(msq - mu * mu, 0.0)                  # unbiased=False
    inv = jax.lax.rsqrt(var + 1e-5)
    w = w_ref[...].astype(jnp.float32)
    # BiasFree variant: divide un-centered x by sqrt(var + eps).
    o_ref[...] = ((x * inv) * w).astype(o_ref.dtype)


def _pick_tile_hw(hw, c, itemsize):
    """Lane-dense spatial tile sized toward ~0.5 MiB per input block."""
    target_bytes = 512 * 1024
    max_tile = max(128, (target_bytes // max(1, c * itemsize)) // 128 * 128)
    if hw <= max_tile:
        # Full spatial extent: always a legal last-dim block size.
        return hw, 1
    # Multiple-of-128 tile; partial last block handled by masked writes.
    return max_tile, pl.cdiv(hw, max_tile)


@functools.partial(jax.jit, static_argnames=("layernorm_type",))
def layernorm_nchw(x, weight, bias, *, layernorm_type="WithBias"):
    """LayerNorm over the channel dim of an NCHW tensor (fftformer semantics)."""
    B, C, H, W = x.shape
    HW = H * W

    xr = x.reshape(B, C, HW)                               # free view, no relayout
    itemsize = jnp.dtype(x.dtype).itemsize
    tile_hw, grid_hw = _pick_tile_hw(HW, C, itemsize)
    grid = (B, grid_hw)

    w2 = weight.reshape(C, 1)                              # keep native dtype
    x_spec = pl.BlockSpec((1, C, tile_hw), lambda b, t: (b, 0, t))
    o_spec = pl.BlockSpec((1, C, tile_hw), lambda b, t: (b, 0, t))
    par_spec = pl.BlockSpec((C, 1), lambda b, t: (0, 0))
    out_shape = jax.ShapeDtypeStruct((B, C, HW), x.dtype)
    cparams = pltpu.CompilerParams(
        dimension_semantics=("parallel", "parallel"),
        vmem_limit_bytes=48 * 1024 * 1024,                 # safe on v5e/v6e/v7x
    )

    if layernorm_type == "BiasFree":
        out = pl.pallas_call(
            _ln_biasfree_kernel,
            out_shape=out_shape,
            grid=grid,
            in_specs=[x_spec, par_spec],
            out_specs=o_spec,
            compiler_params=cparams,
        )(xr, w2)
    else:
        b2 = bias.reshape(C, 1)
        out = pl.pallas_call(
            _ln_withbias_kernel,
            out_shape=out_shape,
            grid=grid,
            in_specs=[x_spec, par_spec, par_spec],
            out_specs=o_spec,
            compiler_params=cparams,
        )(xr, w2, b2)

    return out.reshape(B, C, H, W)


def _reference_layernorm_nchw(x, weight, bias, layernorm_type):
    # Pure-JAX reference mirroring the PyTorch module exactly.
    B, C, H, W = x.shape
    x3 = jnp.transpose(x, (0, 2, 3, 1)).reshape(B, H * W, C).astype(jnp.float32)
    mu = jnp.mean(x3, axis=-1, keepdims=True)
    var = jnp.mean((x3 - mu) ** 2, axis=-1, keepdims=True)
    if layernorm_type == "BiasFree":
        y = x3 / jnp.sqrt(var + 1e-5) * weight
    else:
        y = (x3 - mu) / jnp.sqrt(var + 1e-5) * weight + bias
    y = y.astype(x.dtype)
    return jnp.transpose(y.reshape(B, H, W, C), (0, 3, 1, 2))


if __name__ == "__main__":
    key = jax.random.PRNGKey(0)
    B, C, H, W = 2, 4, 16, 16
    x = jax.random.normal(key, (B, C, H, W), dtype=jnp.float32)

    # Deterministic parameter init, matching nn.Parameter(ones / zeros) shapes.
    weight = jnp.ones((C,), dtype=jnp.float32)
    bias = jnp.zeros((C,), dtype=jnp.float32)

    ok = True
    for ln_type in ("WithBias", "BiasFree"):
        out = layernorm_nchw(x, weight, bias, layernorm_type=ln_type)
        out = jax.block_until_ready(out)
        ref = _reference_layernorm_nchw(x, weight, bias, ln_type)
        if not jnp.allclose(out, ref, atol=1e-5, rtol=1e-5):
            ok = False

    if ok:
        print("KERNEL_OK")
</pallas_src>

<mosaic_0001>
module attributes {stable_mosaic.version = 11 : i64} {
  func.func @_ln_withbias_kernel(%arg0: i32, %arg1: i32, %arg2: memref<1x4x256xf32, #tpu.memory_space<vmem>>, %arg3: memref<4x1xf32, #tpu.memory_space<vmem>>, %arg4: memref<4x1xf32, #tpu.memory_space<vmem>>, %arg5: memref<1x4x256xf32, #tpu.memory_space<vmem>>) attributes {dimension_semantics = [#tpu.dimension_semantics<parallel>, #tpu.dimension_semantics<parallel>], iteration_bounds = array<i64: 2, 1>, scalar_prefetch = 0 : i64, scratch_operands = 0 : i64, tpu.core_type = #tpu.core_type<tc>, window_params = [{transform_indices = @transform_0, window_bounds = array<i64: 1, 4, 256>}, {pipeline_mode = #tpu.pipeline_mode<synchronous>, transform_indices = @transform_1, window_bounds = array<i64: 4, 1>}, {pipeline_mode = #tpu.pipeline_mode<synchronous>, transform_indices = @transform_2, window_bounds = array<i64: 4, 1>}, {transform_indices = @transform_3, window_bounds = array<i64: 1, 4, 256>}]} {
    %c0 = arith.constant 0 : index
    %c0_0 = arith.constant 0 : index
    %c0_1 = arith.constant 0 : index
    %0 = vector.load %arg2[%c0, %c0_0, %c0_1] : memref<1x4x256xf32, #tpu.memory_space<vmem>>, vector<1x4x256xf32>
    %cst = arith.constant dense<0.000000e+00> : vector<1x256xf32>
    %1 = vector.multi_reduction <add>, %0, %cst [1] : vector<1x4x256xf32> to vector<1x256xf32>
    %2 = vector.shape_cast %1 : vector<1x256xf32> to vector<1x1x256xf32>
    %cst_2 = arith.constant 4.000000e+00 : f32
    %3 = vector.broadcast %cst_2 : f32 to vector<1x1x256xf32>
    %4 = arith.divf %2, %3 : vector<1x1x256xf32>
    %5 = arith.mulf %0, %0 : vector<1x4x256xf32>
    %cst_3 = arith.constant dense<0.000000e+00> : vector<1x256xf32>
    %6 = vector.multi_reduction <add>, %5, %cst_3 [1] : vector<1x4x256xf32> to vector<1x256xf32>
    %7 = vector.shape_cast %6 : vector<1x256xf32> to vector<1x1x256xf32>
    %cst_4 = arith.constant 4.000000e+00 : f32
    %8 = vector.broadcast %cst_4 : f32 to vector<1x1x256xf32>
    %9 = arith.divf %7, %8 : vector<1x1x256xf32>
    %10 = arith.mulf %4, %4 : vector<1x1x256xf32>
    %11 = arith.subf %9, %10 : vector<1x1x256xf32>
    %cst_5 = arith.constant 0.000000e+00 : f32
    %12 = vector.broadcast %cst_5 : f32 to vector<1x1x256xf32>
    %13 = arith.maximumf %11, %12 : vector<1x1x256xf32>
    %cst_6 = arith.constant 9.99999974E-6 : f32
    %14 = vector.broadcast %cst_6 : f32 to vector<1x1x256xf32>
    %15 = arith.addf %13, %14 : vector<1x1x256xf32>
    %16 = math.rsqrt %15 : vector<1x1x256xf32>
    %c0_7 = arith.constant 0 : index
    %c0_8 = arith.constant 0 : index
    %17 = vector.load %arg3[%c0_7, %c0_8] : memref<4x1xf32, #tpu.memory_space<vmem>>, vector<4x1xf32>
    %c0_9 = arith.constant 0 : index
    %c0_10 = arith.constant 0 : index
    %18 = vector.load %arg4[%c0_9, %c0_10] : memref<4x1xf32, #tpu.memory_space<vmem>>, vector<4x1xf32>
    %19 = vector.broadcast %4 : vector<1x1x256xf32> to vector<1x4x256xf32>
    %20 = arith.subf %0, %19 : vector<1x4x256xf32>
    %21 = vector.broadcast %16 : vector<1x1x256xf32> to vector<1x4x256xf32>
    %22 = arith.mulf %20, %21 : vector<1x4x256xf32>
    %23 = vector.shape_cast %17 : vector<4x1xf32> to vector<1x4x1xf32>
    %24 = vector.broadcast %23 : vector<1x4x1xf32> to vector<1x4x256xf32>
    %25 = arith.mulf %22, %24 : vector<1x4x256xf32>
    %26 = vector.shape_cast %18 : vector<4x1xf32> to vector<1x4x1xf32>
    %27 = vector.broadcast %26 : vector<1x4x1xf32> to vector<1x4x256xf32>
    %28 = arith.addf %25, %27 : vector<1x4x256xf32>
    %c0_11 = arith.constant 0 : index
    %c0_12 = arith.constant 0 : index
    %c0_13 = arith.constant 0 : index
    %29 = vector.load %arg5[%c0_11, %c0_12, %c0_13] : memref<1x4x256xf32, #tpu.memory_space<vmem>>, vector<1x4x256xf32>
    tpu.vector_store %arg5[%c0_11, %c0_12, %c0_13], %28 {strides = array<i32>} : memref<1x4x256xf32, #tpu.memory_space<vmem>>, vector<1x4x256xf32>,
    return
  }
  func.func @transform_0(%arg0: i32, %arg1: i32) -> (i32, i32, i32) {
    %c0_i32 = arith.constant 0 : i32
    %c0_i32_0 = arith.constant 0 : i32
    return %arg0, %c0_i32, %arg1 : i32, i32, i32
  }
  func.func @transform_1(%arg0: i32, %arg1: i32) -> (i32, i32) {
    %c0_i32 = arith.constant 0 : i32
    %c0_i32_0 = arith.constant 0 : i32
    %c0_i32_1 = arith.constant 0 : i32
    return %c0_i32, %c0_i32_0 : i32, i32
  }
  func.func @transform_2(%arg0: i32, %arg1: i32) -> (i32, i32) {
    %c0_i32 = arith.constant 0 : i32
    %c0_i32_0 = arith.constant 0 : i32
    %c0_i32_1 = arith.constant 0 : i32
    return %c0_i32, %c0_i32_0 : i32, i32
  }
  func.func @transform_3(%arg0: i32, %arg1: i32) -> (i32, i32, i32) {
    %c0_i32 = arith.constant 0 : i32
    %c0_i32_0 = arith.constant 0 : i32
    return %arg0, %c0_i32, %arg1 : i32, i32, i32
  }
}

</mosaic_0001>

<bundles_post_ra>
// kernel: layernorm_nchw.1
= control target key start
LH: loop header
LB: loop body
LE: loop exit
PB: predicated region body
PF: predicated region fallthrough
CT: control target
= control target key end

     0   :  { %s508_s12 = smov 0   ;;  %s510_s13 = smov 0   ;;  %s566_s0 = inlined_call_operand.vmem [shape: f32[2,4,256], index: 0, kind: input, shape index: {}]   ;;  %s567_s1 = inlined_call_operand.vmem [shape: f32[4,1], index: 1, kind: input, shape index: {}]   ;;  %s568_s2 = inlined_call_operand.vmem [shape: f32[4,1], index: 2, kind: input, shape index: {}]   ;;  %s569_s3 = inlined_call_operand.vmem [shape: f32[2,4,256], index: 3, kind: output, shape index: {}]  }
   0x1   :  { %s512_s14 = smov 0  }
   0x2 LB: > { %s25_s15 = sadd.s32 1, %s479_s13  ;;  %p418_p0 = scmp.ge.s32.totalorder %s483_s14, 1  ;;  %s483_s14 = sphi %s512_s14, %s13_s14   ;;  %s479_s13 = sphi %s510_s13, %s571_s13   ;;  %s475_s12 = sphi %s508_s12, %s570_s12  }
   0x3   : > { %p27_p1 = scmp.ge.s32.totalorder %s25_s15, 2  ;;  %p158_p2 = scmp.lt.s32.totalorder %s483_s14, 3 }
   0x5   : > { %s573_s15 = smov (%p27_p1, %s25_s15), 0  ;;  %p159_p3 = pnand %p418_p0, %p158_p2 }
   0x6   : > { %p191_p4 = scmp.lt.s32.totalorder (!%p159_p3), %s475_s12, 1 }
   0x7   : > { %162 = sbr.rel (%p159_p3) target bundleno = 142 (0x8e), region = 32 }
   0xc   : > { %v292_v0 = vld [vmem:[%s567_s1] sm:$0xf]  ;;  %v485_v1 = vmov 0   ;;  %s575_s12 = smov (!%p191_p4, %s475_s12), 1  ;;  %v486_v7 = vmov 4.0   ;;  %vm217_vm0 = vcmask 1043456  }
   0xd   : > { %454 = vset.pattern.permute.xlu0 %v485_v1  ;;  %v293_v2 = vld [vmem:[%s568_s2] sm:$0xf]  ;;  %s425_s20 = sshll.u32 %s575_s12, 3  ;;  %455 = vrcp.f32 %v486_v7  ;;  %v487_v7 = vmov 839922192  }
   0xe   : > { %308 = vperm.xlu0 %454, %v292_v0   ;;  %s198_s23 = scalar_lea.vmem %s566_s0, %s425_s20  ;;  %s208_s26 = scalar_lea.vmem %s569_s3, %s425_s20 }
   0xf   : > { %v540_v3 = vld [vmem:[%s198_s23] sm:$0xff] }
  0x10   : > { %212 = vst [vmem:[#allocation1] ss:$2 sm:$0xff] %v540_v3  ;;  %v241_v4 = vmul.f32 %v540_v3, %v540_v3 }
  0x13   : > { %v456_v13 = vpop.eup %455 }
  0x14   : > { %v233_v18 = vmul.f32 4.0, %v456_v13  ;;  %vm237_vm1 = vweird.f32 %v456_v13 }
  0x16   : > { %318 = vperm.xlu0 %454, %v293_v2   ;;  %v234_v24 = vsub.f32 1.0, %v233_v18 }
  0x17   : > { %v213_v5 = vld.sshfl [vmem:[#allocation1] sm:$0xff pattern:$0x75316420]  ;;  %v214_v6 = vld.sshfl [vmem:[#allocation1 + $0x8] sm:$0xff pattern:$0x75316420] }
  0x18   : > { %243 = vst [vmem:[#allocation1] ss:$2 sm:$0xff] %v241_v4  ;;  %v225_v8 = vsel %vm217_vm0, %v214_v6, 0.0  ;;  %v218_v11 = vsel %vm217_vm0, %v213_v5, 0.0  ;;  %v235_v29 = vmul.f32 %v456_v13, %v234_v24 }
  0x19   : > { %v226_v9 = vrot.slane %v225_v8, 4  ;;  %v219_v14 = vrot.slane %v218_v11, 4 }
  0x1a   : > { %v236_v34 = vadd.f32 %v456_v13, %v235_v29 }
  0x1b   : > { %v227_v15 = vadd.f32 %v226_v9, %v225_v8  ;;  %v220_v20 = vadd.f32 %v219_v14, %v218_v11  ;;  %v311_v8 = vunpack.c.l.s4 %v487_v7 }
  0x1c   : > { %v238_v39 = vsel %vm237_vm1, %v456_v13, %v236_v34 }
  0x1d   : > { %v228_v21 = vrot.slane %v227_v15, 2  ;;  %v221_v25 = vrot.slane %v220_v20, 2  ;;  %v312_v13 = vunpack.c.0.s8 %v311_v8 }
  0x1f   : > { %v245_v10 = vld.sshfl [vmem:[#allocation1 + $0x8] sm:$0xff pattern:$0x75316420]  ;;  %v244_v16 = vld.sshfl [vmem:[#allocation1] sm:$0xff pattern:$0x75316420]  ;;  %v229_v26 = vadd.f32 %v228_v21, %v227_v15  ;;  %v222_v30 = vadd.f32 %v221_v25, %v220_v20 }
  0x20   : > { %v255_v12 = vsel %vm217_vm0, %v245_v10, 0.0  ;;  %v248_v19 = vsel %vm217_vm0, %v244_v16, 0.0 }
  0x21   : > { %v256_v17 = vrot.slane %v255_v12, 4  ;;  %v249_v22 = vrot.slane %v248_v19, 4  ;;  %v230_v31 = vrot.slane %v229_v26, 1  ;;  %v223_v35 = vrot.slane %v222_v30, 1 }
  0x23   : > { %v257_v23 = vadd.f32 %v256_v17, %v255_v12  ;;  %v250_v27 = vadd.f32 %v249_v22, %v248_v19  ;;  %v231_v36 = vadd.f32 %v230_v31, %v229_v26  ;;  %v224_v40 = vadd.f32 %v223_v35, %v222_v30 }
  0x25   : > { %v258_v28 = vrot.slane %v257_v23, 2  ;;  %v251_v32 = vrot.slane %v250_v27, 2  ;;  %v240_v41 = vmul.f32 %v238_v39, %v231_v36  ;;  %v239_v44 = vmul.f32 %v238_v39, %v224_v40 }
  0x27   : > { %v259_v33 = vadd.f32 %v258_v28, %v257_v23  ;;  %v252_v37 = vadd.f32 %v251_v32, %v250_v27  ;;  %v265_v47 = vmul.f32 %v240_v41, %v240_v41  ;;  %v264_v49 = vmul.f32 %v239_v44, %v239_v44 }
  0x28   : > { %v296_v4 = vrot.slane %v240_v41, 4 }
  0x29   : > { %v260_v38 = vrot.slane %v259_v33, 1  ;;  %v253_v42 = vrot.slane %v252_v37, 1 }
  0x2a   : > { %v297_v9 = vsel %vm217_vm0, %v239_v44, %v296_v4 }
  0x2b   : > { %v261_v43 = vadd.f32 %v260_v38, %v259_v33  ;;  %v254_v45 = vadd.f32 %v253_v42, %v252_v37  ;;  %v299_v14 = vsub.f32 %v540_v3, %v297_v9 }
  0x2d   : > { %v263_v46 = vmul.f32 %v261_v43, %v238_v39  ;;  %v262_v48 = vmul.f32 %v254_v45, %v238_v39 }
  0x2f   : > { %v267_v50 = vsub.f32 %v263_v46, %v265_v47  ;;  %v266_v51 = vsub.f32 %v262_v48, %v264_v49 }
  0x31   : > { %v269_v52 = vmax.f32 %v267_v50, 0.0  ;;  %v268_v53 = vmax.f32 %v266_v51, 0.0 }
  0x33   : > { %v271_v54 = vadd.f32 1e-05, %v269_v52  ;;  %v270_v55 = vadd.f32 1e-05, %v268_v53 }
  0x35   : > { %457 = vrsqrt.f32 %v271_v54  ;;  %vm288_vm2 = vweird.f32 %v271_v54  ;;  %vm278_vm5 = vweird.f32 %v270_v55 }
  0x36   : > { %459 = vrsqrt.f32 %v270_v55 }
  0x3b   : > { %v458_v56 = vpop.eup %457 }
  0x3c   : > { %v283_v57 = vmul.f32 %v458_v56, %v271_v54  ;;  %v460_v58 = vpop.eup %459  ;;  %vm289_vm3 = vweird.f32 %v458_v56 }
  0x3d   : > { %v273_v59 = vmul.f32 %v460_v58, %v270_v55  ;;  %vm290_vm4 = vmor %vm288_vm2, %vm289_vm3  ;;  %vm279_vm6 = vweird.f32 %v460_v58 }
  0x3e   : > { %v284_v60 = vmul.f32 %v458_v56, %v283_v57  ;;  %vm280_vm7 = vmor %vm278_vm5, %vm279_vm6 }
  0x3f   : > { %v274_v61 = vmul.f32 %v460_v58, %v273_v59 }
  0x40   : > { %v285_v62 = vmul.f32 0.5, %v284_v60 }
  0x41   : > { %v275_v63 = vmul.f32 0.5, %v274_v61 }
  0x42   : > { %v286_v0 = vsub.f32 1.5, %v285_v62 }
  0x43   : > { %v276_v1 = vsub.f32 1.5, %v275_v63 }
  0x44   : > { %v287_v2 = vmul.f32 %v458_v56, %v286_v0 }
  0x45   : > { %v277_v5 = vmul.f32 %v460_v58, %v276_v1 }
  0x46   : > { %v291_v6 = vsel %vm290_vm4, %v458_v56, %v287_v2 }
  0x47   : > { %v302_v10 = vrot.slane %v291_v6, 4  ;;  %v281_v11 = vsel %vm280_vm7, %v460_v58, %v277_v5 }
  0x49   : > { %v303_v15 = vsel %vm217_vm0, %v281_v11, %v302_v10 }
  0x4a   : > { %v305_v16 = vmul.f32 %v303_v15, %v299_v14 }
  0x80   : > { %v309_v12 = vpop.permute.xlu0 %308 }
  0x81   : > { %v313_v17 = vperm.slane %v309_v12, %v312_v13 }
  0x83   : > { %v315_v19 = vmul.f32 %v313_v17, %v305_v16 }
  0x88   : > { %v319_v18 = vpop.permute.xlu0 %318 }
  0x89   : > { %v323_v20 = vperm.slane %v319_v18, %v312_v13 }
  0x8b   : > { %v325_v21 = vadd.f32 %v323_v20, %v315_v19 }
  0x8d   : > { %326 = vst [vmem:[%s208_s26] sm:$0xff] %v325_v21 }
  0x8e PF: > { %s13_s14 = sadd.s32 1, %s483_s14   ;;  %s570_s12 = smov %s479_s13 }
  0x8f   : > { %p10_p5 = scmp.ge.s32.totalorder %s13_s14, 4   ;;  %s571_s13 = smov %s573_s15 }
  0x91   :  { %12 = sbr.rel (!%p10_p5) target bundleno = 2 (0x2), region = 62 }

</bundles_post_ra>
